<compile_context>
chip_gen: v7x
topology: tpu7x:2x2x1
jax: 0.10.0
libtpu: 0.0.40
codegen_flags: <defaults>
</compile_context>

<pallas_src>
import jax
import jax.numpy as jnp
from jax.experimental import pallas as pl
from jax.experimental.pallas import tpu as pltpu

LANE = 128
SUBLANE = 8


def _round_up(n, m):
    return ((n + m - 1) // m) * m


# ----------------------------- Pallas kernel ---------------------------------
def qnet_twin_fwd_kernel(state_ref, w1_ref, b1_ref, w2v_ref, b2v_ref, q_ref):
    # State normalization is folded into w1/b1 and the encoder's 2nd Linear is
    # fused with the value head, so the kernel is just:
    #   q = ReLU(x @ W1 + b1) @ (W2 @ Wv1) + (b2 @ Wv1 + bv1)
    x = state_ref[...]
    h1 = jnp.dot(x.astype(w1_ref.dtype), w1_ref[...],
                 preferred_element_type=jnp.float32) + b1_ref[...]
    h1 = jnp.maximum(h1, 0.0)
    q = jnp.dot(h1.astype(w2v_ref.dtype), w2v_ref[...],
                preferred_element_type=jnp.float32) + b2v_ref[...]
    q_ref[...] = q.astype(q_ref.dtype)


# --------------------------- parameter preparation ----------------------------
def prepare_params(params, compute_dtype=jnp.float32):
    """Fold state normalization into layer 1, fuse Linear2 with the q-head,
    and pad feature dims to the 128-lane width.

      x_norm @ W1 + b1           == x @ (diag(1/std) @ W1) + (b1 - (avg/std) @ W1)
      (h1 @ W2 + b2) @ Wv1 + bv1 == h1 @ (W2 @ Wv1) + (b2 @ Wv1 + bv1)

    Zero-padding hidden/output dims is numerically exact: padded bias lanes are
    0, ReLU(0)=0 and padded weight rows/cols are 0, so padded lanes never leak.
    Like the PyTorch reference, state_std == 0 still produces inf/NaN.
    compute_dtype=jnp.bfloat16 stores the matmul operands in bf16 (full-rate
    MXU on v6e/v7x, half the weight DMA/VMEM); biases stay f32.
    """
    inv_std = 1.0 / params["state_std"]                        # (1, S)
    w1 = params["w1"] * inv_std.T                              # scale rows of W1
    b1 = params["b1"] - (params["state_avg"] * inv_std) @ params["w1"]

    # Fuse encoder Linear2 with the value head (no activation between them).
    w2v = params["w2"] @ params["wv1"]                         # (d1, action_dim)
    b2v = params["b2"] @ params["wv1"] + params["bv1"]         # (1, action_dim)

    S, d1 = w1.shape
    action_dim = w2v.shape[1]
    D1 = _round_up(max(d1, LANE), LANE)
    AP = _round_up(max(action_dim, LANE), LANE)

    def pad2(m, rows, cols):
        return jnp.pad(m, ((0, rows - m.shape[0]), (0, cols - m.shape[1])))

    wdt = compute_dtype
    return {
        # layer 1 (normalization folded in)
        "w1": pad2(w1, S, D1).astype(wdt),
        "b1": pad2(b1, 1, D1),
        # fused layer2 + head: lane-padded-output and exact-output variants
        "w2v_pad": pad2(w2v, D1, AP).astype(wdt),
        "b2v_pad": pad2(b2v, 1, AP),
        "w2v": pad2(w2v, D1, action_dim).astype(wdt),
        "b2v": b2v,
        # real (unpadded) dims for slicing + honest cost estimates
        "state_dim": int(S), "d1": int(d1), "action_dim": int(action_dim),
        "w_itemsize": int(jnp.dtype(wdt).itemsize),
    }


def _resident_spec(shape, buffer_count):
    """Constant-index (resident) BlockSpec.  Buffered(1) disables pointless
    double-buffering of weights that never change across grid steps."""
    index_map = lambda i: (0, 0)
    if buffer_count is not None:
        try:
            return pl.BlockSpec(shape, index_map,
                                pipeline_mode=pl.Buffered(buffer_count))
        except TypeError:      # older jax without pipeline_mode support
            pass
    return pl.BlockSpec(shape, index_map)


# ------------------------------ wrapper ---------------------------------------
def qnet_twin_forward(state, prep, *, batch_tile=None, pad_output=None,
                      target_cores=1, weight_buffer_count=1):
    """QNetTwin.forward via one fused Pallas kernel (norm + head pre-folded).

    pad_output=True  -> lane-dense 128-wide unmasked output store, wrapper
                        slices action_dim back out (best for small latency
                        batches; default for B <= 1024).
    pad_output=False -> write (B, action_dim) directly: masked store on a few
                        lanes but 16x less output HBM traffic and no extra
                        slice pass (best for large throughput batches).
    """
    B, S = state.shape
    assert S == prep["state_dim"]
    D1 = prep["w1"].shape[1]
    action_dim = prep["action_dim"]

    if pad_output is None:
        pad_output = B <= 1024
    w2v = prep["w2v_pad"] if pad_output else prep["w2v"]
    b2v = prep["b2v_pad"] if pad_output else prep["b2v"]
    out_cols = w2v.shape[1]

    # Batch tiling: per-grid-step overhead (~0.35us) dominates at small sizes,
    # so collapse to one big tile; cap at 2048 rows (a few MB VMEM) and keep
    # >= target_cores steps so a v7x megacore can shard the batch.
    if batch_tile is None:
        cap = 2048
        if B > cap:
            batch_tile = cap
        elif target_cores > 1 and B >= 16 * target_cores:
            batch_tile = pl.cdiv(B, target_cores)
        else:
            batch_tile = B
    batch_tile = _round_up(max(int(batch_tile), SUBLANE), SUBLANE)
    num_steps = pl.cdiv(B, batch_tile)
    B_pad = num_steps * batch_tile
    if B_pad != B:             # ragged batch: zero-pad rows, slice back out below
        state = jnp.pad(state, ((0, B_pad - B), (0, 0)))

    # Advisory cost for XLA's scheduler, in real (unpadded) dims.
    d1 = prep["d1"]
    wb = prep["w_itemsize"]
    flops = 2 * B * (S * d1 + d1 * action_dim)
    bytes_accessed = (4 * B * S                                  # state in
                      + wb * (S * d1 + d1 * action_dim)          # weights
                      + 4 * (d1 + action_dim)                    # biases
                      + 4 * B * action_dim)                      # q out

    q = pl.pallas_call(
        qnet_twin_fwd_kernel,
        out_shape=jax.ShapeDtypeStruct((B_pad, out_cols), jnp.float32),
        grid=(num_steps,),
        in_specs=[
            pl.BlockSpec((batch_tile, S), lambda i: (i, 0)),        # state
            _resident_spec((S, D1), weight_buffer_count),           # W1 (norm folded)
            _resident_spec((1, D1), weight_buffer_count),           # b1
            _resident_spec((D1, out_cols), weight_buffer_count),    # W2 @ Wv1
            _resident_spec((1, out_cols), weight_buffer_count),     # b2 @ Wv1 + bv1
        ],
        out_specs=pl.BlockSpec((batch_tile, out_cols), lambda i: (i, 0)),
        compiler_params=pltpu.CompilerParams(
            dimension_semantics=("parallel",)),
        cost_estimate=pl.CostEstimate(
            flops=flops, transcendentals=0, bytes_accessed=bytes_accessed),
    )(state, prep["w1"], prep["b1"], w2v, b2v)

    if pad_output or B_pad != B:
        q = q[:B, :action_dim]
    return q


# --------------------------- parameter init -----------------------------------
def orthogonal(key, shape, std=1.0):
    # mimic torch.nn.init.orthogonal_ (up to the random draw) via QR
    a = jax.random.normal(key, (max(shape), min(shape)), dtype=jnp.float32)
    q, r = jnp.linalg.qr(a)
    q = q * jnp.sign(jnp.diag(r))          # deterministic sign convention
    if shape[0] < shape[1]:
        q = q.T
    return std * q[: shape[0], : shape[1]]


def init_params(key, state_dim, dims, action_dim):
    d1, d2 = dims
    ks = jax.random.split(key, 6)

    def linear_init(k, fan_in, fan_out):
        # deterministic stand-in for PyTorch's default kaiming-uniform init
        bound = 1.0 / jnp.sqrt(fan_in)
        kw, kb = jax.random.split(k)
        w = jax.random.uniform(kw, (fan_in, fan_out), jnp.float32, -bound, bound)
        b = jax.random.uniform(kb, (1, fan_out), jnp.float32, -bound, bound)
        return w, b

    w1, b1 = linear_init(ks[0], state_dim, d1)
    w2, b2 = linear_init(ks[1], d1, d2)
    # net_val1 last layer: orthogonal(std=0.1), bias = 1e-6 (stored (in, out))
    wv1 = orthogonal(ks[2], (action_dim, d2), std=0.1).T
    bv1 = jnp.full((1, action_dim), 1e-6, dtype=jnp.float32)

    # non-trivial running stats to exercise the normalization fold
    avg = 0.1 * jax.random.normal(ks[3], (1, state_dim), dtype=jnp.float32)
    std = 1.0 + 0.5 * jax.random.uniform(ks[4], (1, state_dim), dtype=jnp.float32)

    return {
        "state_avg": avg, "state_std": std,
        "w1": w1, "b1": b1,
        "w2": w2, "b2": b2,
        "wv1": wv1, "bv1": bv1,
    }


# ------------------------------ reference -------------------------------------
def reference_forward(state, p):
    x = (state - p["state_avg"]) / p["state_std"]
    h1 = jnp.maximum(x @ p["w1"] + p["b1"], 0.0)
    s_enc = h1 @ p["w2"] + p["b2"]
    return s_enc @ p["wv1"] + p["bv1"]


if __name__ == "__main__":
    key = jax.random.PRNGKey(0)
    k_param, k_state = jax.random.split(key)

    state_dim = 16
    dims = (32, 32)
    action_dim = 8
    batch = 64

    params = init_params(k_param, state_dim, dims, action_dim)
    state = jax.random.normal(k_state, (batch, state_dim), dtype=jnp.float32)
    q_ref = reference_forward(state, params)

    # (1) f32 weights, lane-padded output, single grid step (latency path).
    prep = prepare_params(params)
    q = jax.block_until_ready(qnet_twin_forward(state, prep))
    assert q.shape == (batch, action_dim)
    assert jnp.allclose(q, q_ref, atol=1e-3, rtol=1e-3)

    # (2) Unpadded output + 2 grid steps (throughput / megacore path,
    #     exercises Buffered(1) resident weights across steps).
    q2 = jax.block_until_ready(
        qnet_twin_forward(state, prep, batch_tile=32, pad_output=False))
    assert q2.shape == (batch, action_dim)
    assert jnp.allclose(q2, q_ref, atol=1e-3, rtol=1e-3)

    # (3) Ragged batch (exercises zero-padding of batch rows, no hard assert).
    q3 = jax.block_until_ready(qnet_twin_forward(state[:50], prep))
    assert q3.shape == (50, action_dim)
    assert jnp.allclose(q3, q_ref[:50], atol=1e-3, rtol=1e-3)

    # (4) bf16 MXU operands (v6e/v7x fast path); looser tolerance.
    prep_bf16 = prepare_params(params, compute_dtype=jnp.bfloat16)
    q4 = jax.block_until_ready(qnet_twin_forward(state, prep_bf16))
    assert q4.shape == (batch, action_dim)
    assert jnp.allclose(q4, q_ref, atol=2e-2, rtol=5e-2)

    print("KERNEL_OK")
</pallas_src>

<mosaic_0001>
module attributes {stable_mosaic.version = 11 : i64} {
  func.func @qnet_twin_fwd_kernel(%arg0: i32, %arg1: memref<64x16xf32, #tpu.memory_space<vmem>>, %arg2: memref<16x128xf32, #tpu.memory_space<vmem>>, %arg3: memref<1x128xf32, #tpu.memory_space<vmem>>, %arg4: memref<128x128xf32, #tpu.memory_space<vmem>>, %arg5: memref<1x128xf32, #tpu.memory_space<vmem>>, %arg6: memref<64x128xf32, #tpu.memory_space<vmem>>) attributes {dimension_semantics = [#tpu.dimension_semantics<parallel>], iteration_bounds = array<i64: 1>, scalar_prefetch = 0 : i64, scratch_operands = 0 : i64, tpu.core_type = #tpu.core_type<tc>, window_params = [{transform_indices = @transform_0, window_bounds = array<i64: 64, 16>}, {pipeline_mode = #tpu.pipeline_mode<synchronous>, transform_indices = @transform_1, window_bounds = array<i64: 16, 128>}, {pipeline_mode = #tpu.pipeline_mode<synchronous>, transform_indices = @transform_2, window_bounds = array<i64: 1, 128>}, {pipeline_mode = #tpu.pipeline_mode<synchronous>, transform_indices = @transform_3, window_bounds = array<i64: 128, 128>}, {pipeline_mode = #tpu.pipeline_mode<synchronous>, transform_indices = @transform_4, window_bounds = array<i64: 1, 128>}, {transform_indices = @transform_5, window_bounds = array<i64: 64, 128>}]} {
    %c0 = arith.constant 0 : index
    %c0_0 = arith.constant 0 : index
    %0 = vector.load %arg1[%c0, %c0_0] : memref<64x16xf32, #tpu.memory_space<vmem>>, vector<64x16xf32>
    %c0_1 = arith.constant 0 : index
    %c0_2 = arith.constant 0 : index
    %1 = vector.load %arg2[%c0_1, %c0_2] : memref<16x128xf32, #tpu.memory_space<vmem>>, vector<16x128xf32>
    %cst = arith.constant dense<0.000000e+00> : vector<64x128xf32>
    %2 = tpu.matmul %0, %1, %cst {dimension_numbers = #tpu.dot_dimension_numbers<[1], [0], [0], [1], [0, 0, 1, 1], [], []>} : vector<64x16xf32>, vector<16x128xf32>, vector<64x128xf32> -> vector<64x128xf32>
    %c0_3 = arith.constant 0 : index
    %c0_4 = arith.constant 0 : index
    %3 = vector.load %arg3[%c0_3, %c0_4] : memref<1x128xf32, #tpu.memory_space<vmem>>, vector<1x128xf32>
    %4 = vector.broadcast %3 : vector<1x128xf32> to vector<64x128xf32>
    %5 = arith.addf %2, %4 : vector<64x128xf32>
    %cst_5 = arith.constant 0.000000e+00 : f32
    %6 = vector.broadcast %cst_5 : f32 to vector<64x128xf32>
    %7 = arith.maximumf %5, %6 : vector<64x128xf32>
    %c0_6 = arith.constant 0 : index
    %c0_7 = arith.constant 0 : index
    %8 = vector.load %arg4[%c0_6, %c0_7] : memref<128x128xf32, #tpu.memory_space<vmem>>, vector<128x128xf32>
    %cst_8 = arith.constant dense<0.000000e+00> : vector<64x128xf32>
    %9 = tpu.matmul %7, %8, %cst_8 {dimension_numbers = #tpu.dot_dimension_numbers<[1], [0], [0], [1], [0, 0, 1, 1], [], []>} : vector<64x128xf32>, vector<128x128xf32>, vector<64x128xf32> -> vector<64x128xf32>
    %c0_9 = arith.constant 0 : index
    %c0_10 = arith.constant 0 : index
    %10 = vector.load %arg5[%c0_9, %c0_10] : memref<1x128xf32, #tpu.memory_space<vmem>>, vector<1x128xf32>
    %11 = vector.broadcast %10 : vector<1x128xf32> to vector<64x128xf32>
    %12 = arith.addf %9, %11 : vector<64x128xf32>
    %c0_11 = arith.constant 0 : index
    %c0_12 = arith.constant 0 : index
    %13 = vector.load %arg6[%c0_11, %c0_12] : memref<64x128xf32, #tpu.memory_space<vmem>>, vector<64x128xf32>
    tpu.vector_store %arg6[%c0_11, %c0_12], %12 {strides = array<i32>} : memref<64x128xf32, #tpu.memory_space<vmem>>, vector<64x128xf32>,
    return
  }
  func.func @transform_0(%arg0: i32) -> (i32, i32) {
    %c0_i32 = arith.constant 0 : i32
    %c0_i32_0 = arith.constant 0 : i32
    return %arg0, %c0_i32 : i32, i32
  }
  func.func @transform_1(%arg0: i32) -> (i32, i32) {
    %c0_i32 = arith.constant 0 : i32
    %c0_i32_0 = arith.constant 0 : i32
    %c0_i32_1 = arith.constant 0 : i32
    return %c0_i32, %c0_i32_0 : i32, i32
  }
  func.func @transform_2(%arg0: i32) -> (i32, i32) {
    %c0_i32 = arith.constant 0 : i32
    %c0_i32_0 = arith.constant 0 : i32
    %c0_i32_1 = arith.constant 0 : i32
    return %c0_i32, %c0_i32_0 : i32, i32
  }
  func.func @transform_3(%arg0: i32) -> (i32, i32) {
    %c0_i32 = arith.constant 0 : i32
    %c0_i32_0 = arith.constant 0 : i32
    %c0_i32_1 = arith.constant 0 : i32
    return %c0_i32, %c0_i32_0 : i32, i32
  }
  func.func @transform_4(%arg0: i32) -> (i32, i32) {
    %c0_i32 = arith.constant 0 : i32
    %c0_i32_0 = arith.constant 0 : i32
    %c0_i32_1 = arith.constant 0 : i32
    return %c0_i32, %c0_i32_0 : i32, i32
  }
  func.func @transform_5(%arg0: i32) -> (i32, i32) {
    %c0_i32 = arith.constant 0 : i32
    %c0_i32_0 = arith.constant 0 : i32
    return %arg0, %c0_i32 : i32, i32
  }
}

</mosaic_0001>

<bundles_post_ra>
// kernel: tpu_custom_call.1
= control target key start
LH: loop header
LB: loop body
LE: loop exit
PB: predicated region body
PF: predicated region fallthrough
CT: control target
= control target key end

     0   :  { %10 = vsyncpa [#allocation3], 0  ;;  %s659_s0 = inlined_call_operand.vmem [shape: f32[64,16], index: 0, kind: input, shape index: {}]   ;;  %s660_s1 = inlined_call_operand.vmem [shape: f32[16,128], index: 1, kind: input, shape index: {}]   ;;  %s661_s2 = inlined_call_operand.vmem [shape: f32[1,128], index: 2, kind: input, shape index: {}]   ;;  %s662_s3 = inlined_call_operand.hbm [shape: f32[128,128], index: 3, kind: input, shape index: {}]   ;;  %s663_s4 = inlined_call_operand.vmem [shape: f32[1,128], index: 4, kind: input, shape index: {}]   ;;  %s664_s5 = inlined_call_operand.hbm [shape: f32[64,128], index: 5, kind: output, shape index: {}]  }
   0x1   :  { %11 = vsyncpa [#allocation4], 0  ;;  %s551_s18 = smov [#allocation2]   ;;  %s503_s22 = scalar_lea.hbm %s662_s3, 2048 }
   0x2   :  { %s23_s19 = sshll.u32 %s551_s18, 4  ;;  %p504_p0 = scmp.ne.s32.totalorder %s662_s3, %s503_s22  ;;  %s24_s19 = int_to_ptr.vmem [resolvable:$true] %s23_s19 }
   0x3   :  { %p507_p1 = scmp.lt.u32.totalorder %s503_s22, %s662_s3 }
   0x5   :  { %p509_p2 = pnand %p507_p1, %p504_p0 }
   0x7   :  { %512 = shalt.err (!%p509_p2)
}
   0x8   :  { %s513_s27 = scalar_lea.vmem %s24_s19, 2048  ;;  %p518_p4 = scmp.lt.s32.totalorder %s24_s19, %s24_s19 }
   0x9   :  { %p514_p3 = scmp.ne.s32.totalorder %s24_s19, %s513_s27  ;;  %p519_p5 = scmp.lt.s32.totalorder %s513_s27, %s513_s27 }
   0xb   :  { %p520_p6 = por %p519_p5, %p518_p4 }
   0xd   :  { %p521_p7 = pnand %p520_p6, %p514_p3 }
   0xf   :  { %524 = shalt.err (!%p521_p7)
}
  0x10   :  { %s552_s28 = smov 128   ;;  %s553_s29 = smov 8  }
  0x11   :  { %29 = dma.hbm_to_vmem [thread:$0]  %s662_s3, 2048, %s24_s19, [#allocation3], %s552_s28, %s552_s28, %s553_s29  }
  0x12   :  { %547 = dma.done.wait [#allocation3], 2048  }
  0x13   :  { %548 = vsyncadd [#allocation3], 4294965248  ;;  %vm52_vm0 = vcmask 130048   ;;  %v43_v0 = vld [vmem:[%s660_s1] sm:$0xff]  ;;  %v44_v1 = vld [vmem:[%s660_s1 + $0x8] sm:$0xff]  ;;  %s554_s27 = smov [#allocation5]  }
  0x14   :  { %v35_v2 = vld [vmem:[%s659_s0] sm:$0xff]  ;;  %v447_v3 = vpack.c.bf16 %v44_v1, %v43_v0  ;;  %v191_v5 = vld [vmem:[#allocation2 + $0x8] sm:$0xff]  ;;  %v192_v8 = vld [vmem:[#allocation2 + $0x10] sm:$0xff]  ;;  %s331_s30 = sshll.u32 %s554_s27, 4  ;;  %s332_s30 = int_to_ptr.vmem [resolvable:$true] %s331_s30 }
  0x15   :  { %391 = vmatprep.mubr.msk.f32.mxu0 %vm52_vm0, %v35_v2  ;;  %v190_v4 = vld [vmem:[#allocation2] sm:$0xff]  ;;  %v36_v6 = vld [vmem:[%s659_s0 + $0x8] sm:$0xff]  ;;  %v193_v9 = vld [vmem:[#allocation2 + $0x18] sm:$0xff]  ;;  %p530_p9 = scmp.lt.s32.totalorder %s332_s30, %s332_s30 }
  0x16   :  { %448 = vmatprep.subr.bf16.mxu0 %v447_v3  ;;  %v451_v7 = vpack.c.bf16 %v191_v5, %v190_v4  ;;  %v37_v10 = vld [vmem:[%s659_s0 + $0x10] sm:$0xff]  ;;  %v455_v11 = vpack.c.bf16 %v193_v9, %v192_v8  ;;  %v194_v12 = vld [vmem:[#allocation2 + $0x20] sm:$0xff]  ;;  %v195_v13 = vld [vmem:[#allocation2 + $0x28] sm:$0xff] }
  0x17   :  { %450 = vmatpush3.bf16.msra.mxu0 %v447_v3  ;;  %v38_v14 = vld [vmem:[%s659_s0 + $0x18] sm:$0xff]  ;;  %v39_v15 = vld [vmem:[%s659_s0 + $0x20] sm:$0xff]  ;;  %v459_v16 = vpack.c.bf16 %v195_v13, %v194_v12  ;;  %v196_v17 = vld [vmem:[#allocation2 + $0x30] sm:$0xff] }
  0x18   :  { %452 = vmatprep.subr.bf16.mxu0 %v451_v7  ;;  %483 = vmatprep.subr.bf16.mxu1 %v451_v7  ;;  %v197_v18 = vld [vmem:[#allocation2 + $0x38] sm:$0xff]  ;;  %v40_v19 = vld [vmem:[%s659_s0 + $0x28] sm:$0xff]  ;;  %v41_v20 = vld [vmem:[%s659_s0 + $0x30] sm:$0xff] }
  0x19   :  { %491 = vmatpush3.bf16.msra.mxu1 %v451_v7  ;;  %v463_v21 = vpack.c.bf16 %v197_v18, %v196_v17  ;;  %v198_v22 = vld [vmem:[#allocation2 + $0x40] sm:$0xff]  ;;  %v199_v23 = vld [vmem:[#allocation2 + $0x48] sm:$0xff]  ;;  %v42_v24 = vld [vmem:[%s659_s0 + $0x38] sm:$0xff] }
  0x1a   :  { %392 = vmatmul.mubr.msk.f32.vlgmr.msra.gmra.mrb[0].mxu0 %vm52_vm0, %v36_v6  ;;  %484 = vmatprep.subr.bf16.mxu1 %v455_v11  ;;  %v467_v25 = vpack.c.bf16 %v199_v23, %v198_v22  ;;  %v200_v26 = vld [vmem:[#allocation2 + $0x50] sm:$0xff]  ;;  %v201_v27 = vld [vmem:[#allocation2 + $0x58] sm:$0xff]  ;;  %v202_v29 = vld [vmem:[#allocation2 + $0x60] sm:$0xff] }
  0x1b   :  { %394 = vmatprep.mubr.msk.f32.mxu0 %vm52_vm0, %v37_v10  ;;  %454 = vmatpush3.bf16.msra.mxu0 %v451_v7  ;;  %v471_v28 = vpack.c.bf16 %v201_v27, %v200_v26  ;;  %v203_v30 = vld [vmem:[#allocation2 + $0x68] sm:$0xff]  ;;  %v204_v32 = vld [vmem:[#allocation2 + $0x70] sm:$0xff]  ;;  %v205_v33 = vld [vmem:[#allocation2 + $0x78] sm:$0xff] }
  0x1c   :  { %456 = vmatprep.subr.bf16.mxu0 %v455_v11  ;;  %v475_v31 = vpack.c.bf16 %v203_v30, %v202_v29  ;;  %v479_v34 = vpack.c.bf16 %v205_v33, %v204_v32  ;;  %v343_v35 = vld [vmem:[%s661_s2] ss:$0 sm:$0xff] }
  0x1d   :  { %492 = vmatpush3.bf16.msra.mxu1 %v455_v11  ;;  %v352_v60 = vld [vmem:[%s663_s4] ss:$0 sm:$0xff]  ;;  %s525_s4 = scalar_lea.vmem %s332_s30, 1024 }
  0x1e   :  { %395 = vmatmul.mubr.msk.f32.gmra.mrb[2].mxu0 %vm52_vm0, %v38_v14  ;;  %485 = vmatprep.subr.bf16.mxu1 %v459_v16  ;;  %p526_p8 = scmp.ne.s32.totalorder %s332_s30, %s525_s4  ;;  %p531_p10 = scmp.lt.s32.totalorder %s525_s4, %s525_s4 }
  0x1f   :  { %397 = vmatprep.mubr.msk.f32.mxu0 %vm52_vm0, %v39_v15  ;;  %458 = vmatpush3.bf16.msra.mxu0 %v455_v11 }
  0x20   :  { %460 = vmatprep.subr.bf16.mxu0 %v459_v16  ;;  %p532_p11 = por %p531_p10, %p530_p9 }
  0x21   :  { %493 = vmatpush3.bf16.msra.mxu1 %v459_v16 }
  0x22   :  { %398 = vmatmul.mubr.msk.f32.gmra.mrb[4].mxu0 %vm52_vm0, %v40_v19  ;;  %486 = vmatprep.subr.bf16.mxu1 %v463_v21  ;;  %p533_p12 = pnand %p532_p11, %p526_p8 }
  0x23   :  { %400 = vmatprep.mubr.msk.f32.mxu0 %vm52_vm0, %v41_v20  ;;  %462 = vmatpush3.bf16.msra.mxu0 %v459_v16 }
  0x24   :  { %464 = vmatprep.subr.bf16.mxu0 %v463_v21 }
  0x25   :  { %494 = vmatpush3.bf16.msra.mxu1 %v463_v21 }
  0x26   :  { %401 = vmatmul.mubr.msk.f32.gmra.mrb[6].mxu0 %vm52_vm0, %v42_v24  ;;  %487 = vmatprep.subr.bf16.mxu1 %v467_v25 }
  0x27   :  { %466 = vmatpush3.bf16.msra.mxu0 %v463_v21 }
  0x28   :  { %468 = vmatprep.subr.bf16.mxu0 %v467_v25 }
  0x29   :  { %495 = vmatpush3.bf16.msra.mxu1 %v467_v25 }
  0x2a   :  { %488 = vmatprep.subr.bf16.mxu1 %v471_v28 }
  0x2b   :  { %470 = vmatpush3.bf16.msra.mxu0 %v467_v25 }
  0x2c   :  { %472 = vmatprep.subr.bf16.mxu0 %v471_v28 }
  0x2d   :  { %496 = vmatpush3.bf16.msra.mxu1 %v471_v28 }
  0x2e   :  { %489 = vmatprep.subr.bf16.mxu1 %v475_v31 }
  0x2f   :  { %474 = vmatpush3.bf16.msra.mxu0 %v471_v28 }
  0x30   :  { %476 = vmatprep.subr.bf16.mxu0 %v475_v31 }
  0x31   :  { %497 = vmatpush3.bf16.msra.mxu1 %v475_v31 }
  0x32   :  { %490 = vmatprep.subr.bf16.mxu1 %v479_v34 }
  0x33   :  { %478 = vmatpush3.bf16.msra.mxu0 %v475_v31 }
  0x34   :  { %480 = vmatprep.subr.bf16.mxu0 %v479_v34 }
  0x35   :  { %498 = vmatpush3.bf16.msra.mxu1 %v479_v34 }
  0x37   :  { %482 = vmatpush3.bf16.msra.mxu0 %v479_v34 }
  0xed   :  { %v393_v36 = vpop.f32.mrb[0].mxu0 }
  0xee   :  { %v149_v37 = vadd.f32 %v393_v36, %v343_v35  ;;  %v143_v38 = vpop.f32.mrb[1].mxu0 }
  0xef   :  { %v144_v39 = vadd.f32 %v343_v35, %v143_v38 }
  0xf0   :  { %v183_v42 = vmax.f32 %v149_v37, 0.0 }
  0xf1   :  { %v182_v40 = vmax.f32 %v144_v39, 0.0  ;;  %v396_v41 = vpop.f32.mrb[2].mxu0 }
  0xf2   :  { %v159_v43 = vadd.f32 %v396_v41, %v343_v35  ;;  %v153_v44 = vpop.f32.mrb[3].mxu0 }
  0xf3   :  { %435 = vmatprep.mubr.f32.mxu0 %v182_v40  ;;  %v154_v45 = vadd.f32 %v343_v35, %v153_v44 }
  0xf4   :  { %436 = vmatmul.mubr.f32.vlgmr.msra.gmra.mrb[8].mxu0 %v183_v42  ;;  %v185_v48 = vmax.f32 %v159_v43, 0.0 }
  0xf5   :  { %v399_v46 = vpop.f32.mrb[4].mxu0  ;;  %v184_v47 = vmax.f32 %v154_v45, 0.0 }
  0xf6   :  { %v169_v49 = vadd.f32 %v399_v46, %v343_v35  ;;  %v163_v50 = vpop.f32.mrb[5].mxu0 }
  0xf7   :  { %v164_v51 = vadd.f32 %v343_v35, %v163_v50  ;;  %438 = vmatprep.mubr.f32.mxu1 %v184_v47 }
  0xf8   :  { %439 = vmatmul.mubr.f32.vlgmr.msra.gmra.mrb[0].mxu1 %v185_v48  ;;  %v187_v54 = vmax.f32 %v169_v49, 0.0 }
  0xf9   :  { %v186_v52 = vmax.f32 %v164_v51, 0.0  ;;  %v402_v53 = vpop.f32.mrb[6].mxu0 }
  0xfa   :  { %v179_v55 = vadd.f32 %v402_v53, %v343_v35  ;;  %v173_v56 = vpop.f32.mrb[7].mxu0 }
  0xfb   :  { %v174_v57 = vadd.f32 %v343_v35, %v173_v56  ;;  %441 = vmatprep.mubr.f32.mxu1 %v186_v52 }
  0xfc   :  { %442 = vmatmul.mubr.f32.gmra.mrb[2].mxu1 %v187_v54  ;;  %v189_v59 = vmax.f32 %v179_v55, 0.0 }
  0xfd   :  { %v188_v58 = vmax.f32 %v174_v57, 0.0 }
  0xff   :  { %444 = vmatprep.mubr.f32.mxu1 %v188_v58 }
 0x100   :  { %445 = vmatmul.mubr.f32.gmra.mrb[4].mxu1 %v189_v59 }
 0x1c7   :  { %v437_v61 = vpop.f32.mrb[8].mxu0 }
 0x1c8   :  { %v285_v62 = vadd.f32 %v437_v61, %v352_v60  ;;  %v279_v63 = vpop.f32.mrb[9].mxu0 }
 0x1c9   :  { %v280_v0 = vadd.f32 %v352_v60, %v279_v63 }
 0x1ca   :  { %319 = vst [vmem:[#allocation5 + $0x8] sm:$0xff] %v285_v62 }
 0x1cb   :  { %318 = vst [vmem:[#allocation5] sm:$0xff] %v280_v0  ;;  %v440_v1 = vpop.f32.mrb[0].mxu1 }
 0x1cc   :  { %v295_v2 = vadd.f32 %v440_v1, %v352_v60  ;;  %v289_v3 = vpop.f32.mrb[1].mxu1 }
 0x1cd   :  { %v290_v4 = vadd.f32 %v352_v60, %v289_v3 }
 0x1ce   :  { %321 = vst [vmem:[#allocation5 + $0x18] sm:$0xff] %v295_v2 }
 0x1cf   :  { %320 = vst [vmem:[#allocation5 + $0x10] sm:$0xff] %v290_v4  ;;  %v443_v5 = vpop.f32.mrb[2].mxu1 }
 0x1d0   :  { %v305_v6 = vadd.f32 %v443_v5, %v352_v60  ;;  %v299_v7 = vpop.f32.mrb[3].mxu1 }
 0x1d1   :  { %v300_v8 = vadd.f32 %v352_v60, %v299_v7 }
 0x1d2   :  { %323 = vst [vmem:[#allocation5 + $0x28] sm:$0xff] %v305_v6 }
 0x1d3   :  { %322 = vst [vmem:[#allocation5 + $0x20] sm:$0xff] %v300_v8  ;;  %v446_v9 = vpop.f32.mrb[4].mxu1 }
 0x1d4   :  { %v315_v10 = vadd.f32 %v446_v9, %v352_v60  ;;  %v309_v11 = vpop.f32.mrb[5].mxu1 }
 0x1d5   :  { %v310_v12 = vadd.f32 %v352_v60, %v309_v11 }
 0x1d6   :  { %325 = vst [vmem:[#allocation5 + $0x38] sm:$0xff] %v315_v10 }
 0x1d7   :  { %324 = vst [vmem:[#allocation5 + $0x30] sm:$0xff] %v310_v12 }
 0x1d8   :  { %536 = shalt.err (!%p533_p12)
}
 0x1d9   :  { %s537_s8 = scalar_lea.hbm %s664_s5, 1024 }
 0x1da   :  { %p538_p13 = scmp.ne.s32.totalorder %s664_s5, %s537_s8  ;;  %p541_p0 = scmp.lt.u32.totalorder %s537_s8, %s664_s5 }
 0x1dc   :  { %p543_p1 = pnand %p541_p0, %p538_p13 }
 0x1de   :  { %546 = shalt.err (!%p543_p1)
}
 0x1df   :  { %337 = dma.vmem_to_hbm [thread:$0]  %s332_s30, 1024, %s664_s5, [#allocation4], %s552_s28, %s552_s28, %s553_s29  }
 0x1e0   :  { %549 = dma.done.wait [#allocation4], 1024  }
 0x1e1   :  { %550 = vsyncadd [#allocation4], 4294966272 }
 0x1e2   :  { %341 = vsyncpa [#allocation3], 1 }
 0x1e3   :  { %342 = vsyncpa [#allocation4], 1 }

</bundles_post_ra>
